<compile_context>
chip_gen: v7x
topology: tpu7x:2x2x1
jax: 0.10.0
libtpu: 0.0.40
codegen_flags: <defaults>
</compile_context>

<pallas_src>
import jax
import jax.numpy as jnp
from jax.experimental import pallas as pl
from jax.experimental.pallas import tpu as pltpu


def _convt_matmul_kernel(w_ref, x_ref, b_ref, o_ref):
    # w_ref: (R, Cin)   x_ref: (Cin, TN)   b_ref: (R, 1)   o_ref: (R, TN)
    acc = jnp.dot(w_ref[...], x_ref[...], preferred_element_type=jnp.float32)
    o_ref[...] = (acc + b_ref[...]).astype(o_ref.dtype)


def _pick_spatial_tile(m, n_batch, tn_max=1024):
    """Lane tile over M=H*W: multiple of 128, as large as tn_max, but keep
    >= 2 parallel grid steps so both v7x TensorCores get work."""
    m128 = pl.cdiv(m, 128) * 128
    tn = max(128, (min(tn_max, m128) // 128) * 128)
    while n_batch * pl.cdiv(m128, tn) < 2 and tn > 128:
        tn -= 128
    return tn


def upsample_conv_transpose2d(x, weight, bias, kernel, stride, *,
                              tn_max=1024, compute_dtype=None):
    """ConvTranspose2d forward (no padding).

    x: (N, Cin, H, W) NCHW, weight: (Cin, Cout, K, K) (PyTorch layout),
    bias: (Cout,).  Set compute_dtype=jnp.bfloat16 on v6e/v7x for half the
    input DMA bytes (f32 accumulation is kept either way)."""
    N, Cin, H, W = x.shape
    Cin_w, Cout, KH, KW = weight.shape
    assert Cin == Cin_w and KH == kernel and KW == kernel
    assert stride >= kernel, "stride < kernel (overlapping) not supported"

    Hout = (H - 1) * stride + kernel
    Wout = (W - 1) * stride + kernel
    R = Cout * KH * KW          # output rows, ordered Cout-major then (kh, kw)
    M = H * W

    # ---- glue: no full-tensor transpose / copy of x --------------------------
    x3 = x.reshape(N, Cin, M)                                        # pure reshape
    w2dT = jnp.transpose(weight, (1, 2, 3, 0)).reshape(R, Cin)       # tiny
    b_col = jnp.repeat(bias, KH * KW).reshape(R, 1).astype(jnp.float32)

    if compute_dtype is not None:
        x3 = x3.astype(compute_dtype)
        w2dT = w2dT.astype(compute_dtype)

    tn = _pick_spatial_tile(M, N, tn_max)
    Mpad = pl.cdiv(M, tn) * tn
    if Mpad != M:
        # Only taken when H*W is not lane-tile aligned; padded lanes get bias
        # and are sliced off below.
        x3 = jnp.pad(x3, ((0, 0), (0, 0), (0, Mpad - M)))

    # VMEM budget: double-buffered x/out tiles + (once-fetched) weight & bias,
    # worst-cased at f32.  Capped below v7x's 64 MiB physical VMEM.
    est = (2 * (Cin + R) * tn + 2 * R * (Cin + 1)) * 4
    vmem_limit = int(min(max(4 * est, 16 * 2**20), 48 * 2**20))

    out3 = pl.pallas_call(
        _convt_matmul_kernel,
        out_shape=jax.ShapeDtypeStruct((N, R, Mpad), x.dtype),
        grid_spec=pltpu.PrefetchScalarGridSpec(
            num_scalar_prefetch=0,
            grid=(N, Mpad // tn),
            in_specs=[
                pl.BlockSpec((R, Cin), lambda n, m: (0, 0)),          # invariant
                pl.BlockSpec((None, Cin, tn), lambda n, m: (n, 0, m)),
                pl.BlockSpec((R, 1), lambda n, m: (0, 0)),            # invariant
            ],
            out_specs=pl.BlockSpec((None, R, tn), lambda n, m: (n, 0, m)),
        ),
        compiler_params=pltpu.CompilerParams(
            dimension_semantics=("parallel", "parallel"),
            vmem_limit_bytes=vmem_limit),
    )(w2dT, x3, b_col)

    out3 = out3[:, :, :M]
    patches = out3.reshape(N, Cout, KH, KW, H, W)

    # ---- glue: interleave the K*K patches into the NCHW output ---------------
    if stride == kernel:
        # out[n, c, ih*K+kh, iw*K+kw] = patches[n, c, kh, kw, ih, iw]
        out = jnp.transpose(patches, (0, 1, 4, 2, 5, 3)).reshape(N, Cout, Hout, Wout)
    else:
        # gaps between patches only receive the bias term (ConvTranspose2d semantics)
        out = jnp.broadcast_to(bias[None, :, None, None],
                               (N, Cout, Hout, Wout)).astype(x.dtype)
        for kh in range(KH):
            for kw in range(KW):
                out = out.at[:, :,
                             kh:kh + (H - 1) * stride + 1:stride,
                             kw:kw + (W - 1) * stride + 1:stride
                             ].set(patches[:, :, kh, kw])
    return out


def _reference_conv_transpose2d(x, weight, bias, kernel, stride):
    """Pure-JAX reference implementing the ConvTranspose2d definition directly."""
    N, Cin, H, W = x.shape
    _, Cout, KH, KW = weight.shape
    Hout = (H - 1) * stride + kernel
    Wout = (W - 1) * stride + kernel
    out = jnp.zeros((N, Cout, Hout, Wout), x.dtype)
    for kh in range(KH):
        for kw in range(KW):
            contrib = jnp.einsum('nchw,cd->ndhw', x, weight[:, :, kh, kw])
            out = out.at[:, :,
                         kh:kh + (H - 1) * stride + 1:stride,
                         kw:kw + (W - 1) * stride + 1:stride].add(contrib)
    return out + bias[None, :, None, None]


if __name__ == "__main__":
    # Module config (kernel == stride, the classic upsample):
    batch, input_dim, output_dim, kernel, stride, spatial = 2, 4, 8, 2, 2, 16

    key = jax.random.PRNGKey(0)
    kx, kw, kb = jax.random.split(key, 3)

    x = jax.random.normal(kx, (batch, input_dim, spatial, spatial), jnp.float32)
    # Deterministic parameter init (PyTorch-like uniform bound 1/sqrt(Cin*K*K)).
    bound = 1.0 / jnp.sqrt(jnp.float32(input_dim * kernel * kernel))
    weight = jax.random.uniform(kw, (input_dim, output_dim, kernel, kernel),
                                jnp.float32, -bound, bound)
    bias = jax.random.uniform(kb, (output_dim,), jnp.float32, -bound, bound)

    out = upsample_conv_transpose2d(x, weight, bias, kernel, stride)
    out = jax.block_until_ready(out)

    ref = _reference_conv_transpose2d(x, weight, bias, kernel, stride)
    assert out.shape == (batch, output_dim,
                         (spatial - 1) * stride + kernel,
                         (spatial - 1) * stride + kernel)
    assert jnp.allclose(out, ref, rtol=1e-5, atol=1e-5), "mismatch vs reference"

    print("KERNEL_OK")
</pallas_src>

<mosaic_0001>
module attributes {stable_mosaic.version = 11 : i64} {
  func.func @_convt_matmul_kernel(%arg0: i32, %arg1: i32, %arg2: memref<32x4xf32, #tpu.memory_space<vmem>>, %arg3: memref<1x4x256xf32, #tpu.memory_space<vmem>>, %arg4: memref<32x1xf32, #tpu.memory_space<vmem>>, %arg5: memref<1x32x256xf32, #tpu.memory_space<vmem>>) attributes {dimension_semantics = [#tpu.dimension_semantics<parallel>, #tpu.dimension_semantics<parallel>], iteration_bounds = array<i64: 2, 1>, scalar_prefetch = 0 : i64, scratch_operands = 0 : i64, tpu.core_type = #tpu.core_type<tc>, window_params = [{pipeline_mode = #tpu.pipeline_mode<synchronous>, transform_indices = @transform_0, window_bounds = array<i64: 32, 4>}, {transform_indices = @transform_1, window_bounds = array<i64: 1, 4, 256>}, {pipeline_mode = #tpu.pipeline_mode<synchronous>, transform_indices = @transform_2, window_bounds = array<i64: 32, 1>}, {transform_indices = @transform_3, window_bounds = array<i64: 1, 32, 256>}]} {
    %c0 = arith.constant 0 : index
    %c0_0 = arith.constant 0 : index
    %0 = vector.load %arg2[%c0, %c0_0] : memref<32x4xf32, #tpu.memory_space<vmem>>, vector<32x4xf32>
    %c0_1 = arith.constant 0 : index
    %c0_2 = arith.constant 0 : index
    %c0_3 = arith.constant 0 : index
    %1 = vector.load %arg3[%c0_1, %c0_2, %c0_3] : memref<1x4x256xf32, #tpu.memory_space<vmem>>, vector<1x4x256xf32>
    %2 = vector.shape_cast %1 : vector<1x4x256xf32> to vector<4x256xf32>
    %cst = arith.constant dense<0.000000e+00> : vector<32x256xf32>
    %3 = tpu.matmul %0, %2, %cst {dimension_numbers = #tpu.dot_dimension_numbers<[1], [0], [0], [1], [0, 0, 1, 1], [], []>} : vector<32x4xf32>, vector<4x256xf32>, vector<32x256xf32> -> vector<32x256xf32>
    %c0_4 = arith.constant 0 : index
    %c0_5 = arith.constant 0 : index
    %4 = vector.load %arg4[%c0_4, %c0_5] : memref<32x1xf32, #tpu.memory_space<vmem>>, vector<32x1xf32>
    %5 = vector.broadcast %4 : vector<32x1xf32> to vector<32x256xf32>
    %6 = arith.addf %3, %5 : vector<32x256xf32>
    %c0_6 = arith.constant 0 : index
    %c0_7 = arith.constant 0 : index
    %c0_8 = arith.constant 0 : index
    %7 = vector.load %arg5[%c0_6, %c0_7, %c0_8] : memref<1x32x256xf32, #tpu.memory_space<vmem>>, vector<1x32x256xf32>
    %8 = vector.shape_cast %7 : vector<1x32x256xf32> to vector<32x256xf32>
    %9 = vector.shape_cast %6 : vector<32x256xf32> to vector<1x32x256xf32>
    tpu.vector_store %arg5[%c0_6, %c0_7, %c0_8], %9 {strides = array<i32>} : memref<1x32x256xf32, #tpu.memory_space<vmem>>, vector<1x32x256xf32>,
    return
  }
  func.func @transform_0(%arg0: i32, %arg1: i32) -> (i32, i32) {
    %c0_i32 = arith.constant 0 : i32
    %c0_i32_0 = arith.constant 0 : i32
    %c0_i32_1 = arith.constant 0 : i32
    return %c0_i32, %c0_i32_0 : i32, i32
  }
  func.func @transform_1(%arg0: i32, %arg1: i32) -> (i32, i32, i32) {
    %c0_i32 = arith.constant 0 : i32
    %c0_i32_0 = arith.constant 0 : i32
    return %arg0, %c0_i32, %arg1 : i32, i32, i32
  }
  func.func @transform_2(%arg0: i32, %arg1: i32) -> (i32, i32) {
    %c0_i32 = arith.constant 0 : i32
    %c0_i32_0 = arith.constant 0 : i32
    %c0_i32_1 = arith.constant 0 : i32
    return %c0_i32, %c0_i32_0 : i32, i32
  }
  func.func @transform_3(%arg0: i32, %arg1: i32) -> (i32, i32, i32) {
    %c0_i32 = arith.constant 0 : i32
    %c0_i32_0 = arith.constant 0 : i32
    return %arg0, %c0_i32, %arg1 : i32, i32, i32
  }
}

</mosaic_0001>

<bundles_post_ra>
// kernel: tpu_custom_call.1
= control target key start
LH: loop header
LB: loop body
LE: loop exit
PB: predicated region body
PF: predicated region fallthrough
CT: control target
= control target key end

     0   :  { %8 = vsyncpa [#allocation3], 0  ;;  %s774_s0 = inlined_call_operand.vmem [shape: f32[32,4], index: 0, kind: input, shape index: {}]   ;;  %s775_s1 = inlined_call_operand.vmem [shape: f32[2,4,256], index: 1, kind: input, shape index: {}]   ;;  %s776_s2 = inlined_call_operand.vmem [shape: f32[32,1], index: 2, kind: input, shape index: {}]   ;;  %s777_s3 = inlined_call_operand.hbm [shape: f32[2,32,256], index: 3, kind: output, shape index: {}]  }
   0x1   :  { %10 = vsyncpa [#allocation3 + $0x1], 0  ;;  %s631_s12 = smov 0   ;;  %s633_s13 = smov 0  }
   0x2   :  { %s635_s14 = smov 0   ;;  %s637_s15 = smov 0  }
   0x3   :  { %s639_s16 = smov 0   ;;  %s641_s17 = smov 0  }
   0x4 LB: > { %s441_s18 = sadd.s32 4294967295, %s604_s17   ;;  %s442_s19 = sadd.s32 4294967294, %s604_s17   ;;  %s604_s17 = sphi %s641_s17, %s16_s17   ;;  %s600_s16 = sphi %s639_s16, %s784_s16   ;;  %s596_s15 = sphi %s637_s15, %s783_s15   ;;  %s592_s14 = sphi %s635_s14, %s782_s14   ;;  %s588_s13 = sphi %s633_s13, %s781_s13   ;;  %s584_s12 = sphi %s631_s12, %s780_s12  }
   0x5   : > { %s28_s20 = sadd.s32 1, %s600_s16  ;;  %s107_s21 = sadd.s32 1, %s592_s14 }
   0x6   : > { %p30_p0 = scmp.ge.s32.totalorder %s28_s20, 2  ;;  %p117_p1 = scmp.ne.s32.totalorder %s592_s14, %s588_s13 }
   0x7   : > { %p118_p2 = scmp.eq.s32.totalorder %s441_s18, 1  ;;  %p123_p3 = scmp.ne.s32.totalorder %s588_s13, %s584_s12 }
   0x8   : > { %s786_s20 = smov (%p30_p0, %s28_s20), 0  ;;  %p124_p5 = scmp.eq.s32.totalorder %s442_s19, 1 }
   0x9   : > { %p671_p4 = por %p118_p2, %p117_p1  ;;  %s102_s23 = ssub.s32 %s600_s16, %s786_s20 }
   0xa   : > { %p445_p6 = scmp.ge.s32.totalorder %s604_s17, 1  ;;  %p105_p7 = scmp.eq.s32.totalorder %s102_s23, 0 }
   0xb   : > { %p678_p8 = por %p124_p5, %p123_p3  ;;  %p161_p9 = scmp.lt.s32.totalorder %s604_s17, 3 }
   0xc   : > { %s684_s25 = scalar_select %p105_p7, %s592_s14, %s107_s21  }
   0xd   : > { %p162_p10 = pnand %p445_p6, %p161_p9 }
   0xe   : > { %p190_p11 = scmp.lt.s32.totalorder (!%p162_p10), %s596_s15, 1  ;;  %v606_v0 = vmov (!%p162_p10), 0.0   ;;  %v207_v1 = vld [vmem:[%s776_s2 + $0x10] sm:$0xff] (!%p162_p10)  ;;  %v607_v2 = vmov (!%p162_p10), 0   ;;  %v205_v3 = vld [vmem:[%s776_s2] sm:$0xff] (!%p162_p10)  ;;  %v208_v4 = vld [vmem:[%s776_s2 + $0x18] sm:$0xff] (!%p162_p10) }
   0xf   : > { %165 = sbr.rel (%p162_p10) target bundleno = 265 (0x109), region = 32  ;;  %313 = vmatprep.mubr.f32.mxu0 (!%p162_p10), %v606_v0  ;;  %325 = vmatprep.mubr.f32.mxu1 (!%p162_p10), %v606_v0  ;;  %v206_v5 = vld [vmem:[%s776_s2 + $0x8] sm:$0xff] (!%p162_p10)  ;;  %vm244_vm0 = vcmask (!%p162_p10), 1043456   ;;  %v200_v8 = vld [vmem:[%s774_s0] sm:$0xff] (!%p162_p10)  ;;  %vm231_vm1 = vcmask (!%p162_p10), 31744   ;;  %v202_v9 = vld [vmem:[%s774_s0 + $0x10] sm:$0xff] (!%p162_p10) }
  0x10   : > { %524 = vset.pattern.permute.xlu1 (!%p162_p10), %v607_v2  ;;  %523 = vset.pattern.permute.xlu0 (!%p162_p10), %v607_v2  ;;  %v201_v10 = vld [vmem:[%s774_s0 + $0x8] sm:$0xff] (!%p162_p10)  ;;  %v203_v11 = vld [vmem:[%s774_s0 + $0x18] sm:$0xff] (!%p162_p10)  ;;  %s186_s30 = sand.u32 (!%p162_p10), 1, %s588_s13   ;;  %s461_s5 = sshll.u32 (!%p162_p10), %s596_s15, 10 }
  0x11   : > { %221 = vperm.xlu1 (!%p162_p10), %524, %v207_v1   ;;  %211 = vperm.xlu0 (!%p162_p10), %523, %v205_v3   ;;  %s728_s10 = scalar_lea.sflag (!%p162_p10), [#allocation3], %s186_s30  ;;  %s608_s18 = smov (!%p162_p10), [#allocation2]  }
  0x12   : > { %s530_s19 = sshll.u32 (!%p162_p10), %s608_s18, 4  ;;  %s531_s19 = int_to_ptr.vmem [resolvable:$false] %s530_s19 }
  0x13   : > { %s532_s21 = scalar_lea.vmem (!%p162_p10), %s531_s19, 2048 }
  0x15   : > { %226 = vperm.xlu1 (!%p162_p10), %524, %v208_v4   ;;  %216 = vperm.xlu0 (!%p162_p10), %523, %v206_v5  }
  0x16   : > { %s191_s28 = scalar_select %p190_p11, %s596_s15, 1 }
  0x17   : > { %s722_s15 = scalar_lea.hbm %s777_s3, %s461_s5 }
  0x18   : > { %s460_s4 = sshll.u32 %s191_s28, 3 }
  0x19   : > { %s197_s11 = scalar_lea.vmem %s775_s1, %s460_s4  ;;  %s446_s4 = sshll.u32 %s186_s30, 6 }
  0x1a   : > { %v204_v6 = vld [vmem:[%s197_s11] sm:$0xff]  ;;  %s188_s6 = scalar_lea.vmem [#allocation2], %s446_s4 }
  0x1b   : > { %v230_v7 = vcombine.high %v204_v6, %v204_v6  ;;  %s362_s7 = sshll.u32 %s188_s6, 4  ;;  %s724_s7 = int_to_ptr.vmem [resolvable:$true] %s362_s7 }
  0x1c   : > { %s526_s11 = scalar_lea.vmem %s724_s7, 1024  ;;  %p533_p1 = scmp.lt.s32.totalorder %s724_s7, %s531_s19 }
  0x1d   : > { %449 = vmatprep.subr.msk.mxu0 %vm244_vm0, %v230_v7  ;;  %462 = vmatprep.subr.msk.mxu1 %vm244_vm0, %v230_v7  ;;  %p527_p12 = scmp.ne.s32.totalorder %s724_s7, %s526_s11  ;;  %p534_p2 = scmp.lt.s32.totalorder %s532_s21, %s526_s11 }
  0x1e   : > { %450 = vmatpush1.msk.msra.mxu0 %vm244_vm0, %v204_v6  ;;  %463 = vmatpush1.msk.msra.mxu1 %vm244_vm0, %v204_v6 }
  0x1f   : > { %451 = vmatmul.mubr.msk.f32.vlgmr.msra.gmra.mrb[0].mxu0 %vm231_vm1, %v200_v8  ;;  %453 = vmatmul.mubr.msk.f32.vlgmr.msra.gmra.mrb[0].mxu1 %vm231_vm1, %v202_v9  ;;  %p528_p13 = pnand %p527_p12, %p671_p4  ;;  %p535_p3 = por %p534_p2, %p533_p1 }
  0x20   : > { %319 = vmatprep.mubr.f32.mxu0 %v606_v0  ;;  %331 = vmatprep.mubr.f32.mxu1 %v606_v0 }
  0x21   : > { %p529_p0 = pneg %p528_p13 }
  0x23   : > { %452 = vmatmul.mubr.msk.f32.gmra.mrb[2].mxu0 %vm231_vm1, %v201_v10  ;;  %454 = vmatmul.mubr.msk.f32.gmra.mrb[2].mxu1 %vm231_vm1, %v203_v11  ;;  %p536_p5 = pnand %p535_p3, %p529_p0 }
  0x90   : > { %v222_v12 = vpop.permute.xlu1 %221  ;;  %v212_v13 = vpop.permute.xlu0 %211 }
  0x94   : > { %v227_v22 = vpop.permute.xlu1 %226  ;;  %v217_v23 = vpop.permute.xlu0 %216 }
  0xf2   : > { %v315_v14 = vpop.f32.mrb[0].mxu0  ;;  %v327_v15 = vpop.f32.mrb[0].mxu1 }
  0xf3   : > { %v316_v16 = vadd.f32 %v315_v14, %v212_v13  ;;  %v328_v17 = vadd.f32 %v327_v15, %v222_v12  ;;  %v317_v18 = vpop.f32.mrb[1].mxu0  ;;  %v329_v19 = vpop.f32.mrb[1].mxu1 }
  0xf4   : > { %v318_v20 = vadd.f32 %v317_v18, %v212_v13  ;;  %v330_v21 = vadd.f32 %v329_v19, %v222_v12 }
  0xf5   : > { %338 = vst [vmem:[%s188_s6] sm:$0xff] %v316_v16  ;;  %342 = vst [vmem:[%s188_s6 + $0x20] sm:$0xff] %v328_v17 }
  0xf6   : > { %339 = vst [vmem:[%s188_s6 + $0x8] sm:$0xff] %v318_v20  ;;  %343 = vst [vmem:[%s188_s6 + $0x28] sm:$0xff] %v330_v21  ;;  %v321_v24 = vpop.f32.mrb[2].mxu0  ;;  %v333_v25 = vpop.f32.mrb[2].mxu1 }
  0xf7   : > { %v322_v26 = vadd.f32 %v321_v24, %v217_v23  ;;  %v334_v27 = vadd.f32 %v333_v25, %v227_v22  ;;  %v323_v28 = vpop.f32.mrb[3].mxu0  ;;  %v335_v29 = vpop.f32.mrb[3].mxu1 }
  0xf8   : > { %v324_v30 = vadd.f32 %v323_v28, %v217_v23  ;;  %v336_v31 = vadd.f32 %v335_v29, %v227_v22 }
  0xf9   : > { %340 = vst [vmem:[%s188_s6 + $0x10] sm:$0xff] %v322_v26  ;;  %344 = vst [vmem:[%s188_s6 + $0x30] sm:$0xff] %v334_v27 }
  0xfa   : > { %341 = vst [vmem:[%s188_s6 + $0x18] sm:$0xff] %v324_v30  ;;  %345 = vst [vmem:[%s188_s6 + $0x38] sm:$0xff] %v336_v31 }
  0xfb   : > { %539 = shalt.err (!%p536_p5)
}
  0xfc   : > { %s540_s23 = scalar_lea.hbm %s722_s15, 1024  ;;  %s544_s28 = scalar_lea.hbm %s777_s3, 2048 }
  0xfd   : > { %p541_p6 = scmp.ne.s32.totalorder %s722_s15, %s540_s23  ;;  %p545_p10 = scmp.lt.u32.totalorder %s722_s15, %s777_s3 }
  0xfe   : > { %p546_p11 = scmp.lt.u32.totalorder %s544_s28, %s540_s23  ;;  %p548_p13 = scmp.lt.u32.totalorder %s540_s23, %s722_s15 }
  0xff   : > { %p542_p7 = pnand %p541_p6, %p671_p4 }
 0x100   : > { %p547_p12 = por %p546_p11, %p545_p10 }
 0x101   : > { %p543_p9 = pneg %p542_p7 }
 0x102   : > { %p549_p0 = por %p548_p13, %p547_p12 }
 0x104   : > { %p550_p1 = pnand %p549_p0, %p543_p9 }
 0x106   : > { %553 = shalt.err (!%p550_p1)
}
 0x107   : > { %s609_s4 = smov 256   ;;  %s610_s5 = smov 16  }
 0x108   : > { %464 = dma.vmem_to_hbm [thread:$0]  (%p671_p4), %s724_s7, 1024, %s722_s15, %s728_s10, %s609_s4, %s609_s4, %s610_s5  }
 0x109 PF: > { %p470_p2 = scmp.ge.s32.totalorder %s604_s17, 2  ;;  %s377_s6 = sand.u32 1, %s584_s12  }
 0x10a   : > { %s378_s8 = scalar_lea.sflag [#allocation3], %s377_s6 }
 0x10b   : > { %p467_p3 = pnand %p470_p2, %p678_p8 }
 0x10d   : > { %579 = dma.done.wait (!%p467_p3), %s378_s8, 1024  }
 0x10e   : > { %581 = vsyncadd (!%p467_p3), %s378_s8, 4294966272  ;;  %s16_s17 = sadd.s32 1, %s604_s17   ;;  %s780_s12 = smov %s588_s13 }
 0x10f   : > { %p13_p5 = scmp.ge.s32.totalorder %s16_s17, 4   ;;  %s781_s13 = smov %s592_s14 }
 0x110   : > { %s782_s14 = smov %s684_s25  ;;  %s783_s15 = smov %s600_s16 }
 0x111   : > { %s784_s16 = smov %s786_s20  ;;  %15 = sbr.rel (!%p13_p5) target bundleno = 4 (0x4), region = 67 }
 0x118   :  { %383 = vsyncpa [#allocation3], 1 }
 0x119   :  { %385 = vsyncpa [#allocation3 + $0x1], 1 }

</bundles_post_ra>
